<compile_context>
chip_gen: v6e
topology: v6e:2x2x1
jax: 0.10.0
libtpu: 0.0.40
codegen_flags: <defaults>
</compile_context>

<pallas_src>
import functools

import jax
import jax.numpy as jnp
from jax import lax
from jax.experimental import pallas as pl
from jax.experimental.pallas import tpu as pltpu

GATE_ORDER = ("f", "i", "o", "h")


def _lstm_recurrence_kernel(pre_ref, wh_ref, out_ref, long_sc, short_sc, *,
                            t_block, hidden, reverse, mm_dtype):
    """T_B time-steps of the LSTM recurrence; grid axis 0 is the time-block axis
    (strictly sequential: state is carried in VMEM scratch)."""
    kb = pl.program_id(0)
    H = hidden

    @pl.when(kb == 0)
    def _():
        long_sc[...] = jnp.zeros_like(long_sc)
        short_sc[...] = jnp.zeros_like(short_sc)

    def step(j, carry):
        # For the reversed direction the input block is already the mirrored
        # block (see index_map); inside the block we also walk time backwards.
        read_idx = (t_block - 1 - j) if reverse else j
        pre = pre_ref[read_idx]                       # (N, 4H) f32, bias folded in
        short = short_sc[...]                         # (N, H)  f32 hidden state

        gates = jnp.dot(short.astype(mm_dtype), wh_ref[...],
                        preferred_element_type=jnp.float32) + pre   # (N, 4H) f32

        f = jax.nn.sigmoid(gates[:, 0 * H:1 * H])
        i = jax.nn.sigmoid(gates[:, 1 * H:2 * H])
        o = jax.nn.sigmoid(gates[:, 2 * H:3 * H])
        h = gates[:, 3 * H:4 * H]                     # NOTE: no tanh on the candidate,
                                                      # matching the PyTorch module.
        long_new = f * long_sc[...] + i * h
        short_new = o * jnp.tanh(long_new)

        long_sc[...] = long_new
        short_sc[...] = short_new
        out_ref[j] = short_new.astype(out_ref.dtype)  # output always in "own" time order
        return carry

    lax.fori_loop(0, t_block, step, 0, unroll=True)


def _fuse_params(params, mm_dtype):
    """Pack per-gate (2H,H) weights into Wh:(H,4H) (hidden part), Wx:(H,4H)
    (input part) and a single fused bias (1,4H)."""
    H = params["f"][0].shape[1]
    wh = jnp.concatenate([params[g][0][:H, :] for g in GATE_ORDER], axis=1)   # (H, 4H)
    wx = jnp.concatenate([params[g][0][H:, :] for g in GATE_ORDER], axis=1)   # (H, 4H)
    b = jnp.concatenate([params[g][1] for g in GATE_ORDER], axis=1)           # (1, 4H)
    return wh.astype(mm_dtype), wx.astype(mm_dtype), b.astype(jnp.float32)


def lstm_cell_forward(x_nlh, params, *, reverse=False, t_block=None,
                      mm_dtype=jnp.float32):
    """x_nlh: (N, L, H) float32. params[name] = (W: (2H, H), b: (1, H)).

    reverse=True runs the recurrence over the time-reversed input (equivalent to
    LSTMCell(fliplr(x))) without materializing the flipped tensor; the output is
    in the recurrence's own time order (i.e. exactly rl(fliplr(x)))."""
    N, L, H = x_nlh.shape
    if t_block is None:
        t_block = min(L, 16)
    assert L % t_block == 0, "time-block size must divide sequence length"
    nb = L // t_block

    wh, wx, b = _fuse_params(params, mm_dtype)

    # Hoisted input projection (bias folded): one big MXU-friendly matmul done
    # by XLA outside the sequential recurrence.
    x_tm = jnp.transpose(x_nlh, (1, 0, 2))                          # (L, N, H)
    pre = jnp.dot(x_tm.reshape(L * N, H).astype(mm_dtype), wx,
                  preferred_element_type=jnp.float32) + b           # (L*N, 4H) f32
    pre = pre.reshape(L, N, 4 * H)

    if reverse:
        pre_index_map = lambda t: (nb - 1 - t, 0, 0)   # read projection blocks backwards
    else:
        pre_index_map = lambda t: (t, 0, 0)

    kernel = functools.partial(_lstm_recurrence_kernel, t_block=t_block,
                               hidden=H, reverse=reverse, mm_dtype=mm_dtype)

    out = pl.pallas_call(
        kernel,
        out_shape=jax.ShapeDtypeStruct((L, N, H), x_nlh.dtype),
        grid_spec=pltpu.PrefetchScalarGridSpec(
            num_scalar_prefetch=0,
            grid=(nb,),
            in_specs=[pl.BlockSpec((t_block, N, 4 * H), pre_index_map),
                      pl.BlockSpec((H, 4 * H), lambda t: (0, 0))],   # resident weights
            out_specs=pl.BlockSpec((t_block, N, H), lambda t: (t, 0, 0)),
            scratch_shapes=[pltpu.VMEM((N, H), jnp.float32),   # long (cell) state
                            pltpu.VMEM((N, H), jnp.float32)],  # short (hidden) state
        ),
        compiler_params=pltpu.CompilerParams(
            dimension_semantics=("arbitrary",),        # recurrence: strictly sequential
            vmem_limit_bytes=32 * 1024 * 1024),
    )(pre, wh)
    return jnp.transpose(out, (1, 0, 2))               # back to (N, L, H)


def bilstm_forward(x, params_lr, params_rl, *, t_block=None, mm_dtype=jnp.float32):
    """Matches BiLSTMCell.forward: rl(fliplr(lr(x))); output NOT re-flipped.
    The flip is folded into the second pass's index_map (no HBM round trip)."""
    mem = lstm_cell_forward(x, params_lr, reverse=False, t_block=t_block,
                            mm_dtype=mm_dtype)
    mem = lstm_cell_forward(mem, params_rl, reverse=True, t_block=t_block,
                            mm_dtype=mm_dtype)
    return mem
    # TODO(synk): add a leading batch-tile grid axis with ("parallel","arbitrary")
    # for v7x dual-TensorCore once N*H is large enough to satisfy (8,128) tiling.


# ---------------------------- pure-JAX reference ----------------------------

def _lstm_ref(x, params):
    N, L, H = x.shape
    long = jnp.zeros((N, H), jnp.float32)
    short = jnp.zeros((N, H), jnp.float32)
    outs = []
    for t in range(L):
        cat = jnp.concatenate([short, x[:, t]], axis=-1)
        f = jax.nn.sigmoid(cat @ params["f"][0] + params["f"][1])
        i = jax.nn.sigmoid(cat @ params["i"][0] + params["i"][1])
        o = jax.nn.sigmoid(cat @ params["o"][0] + params["o"][1])
        h = cat @ params["h"][0] + params["h"][1]
        long = f * long + i * h
        short = o * jnp.tanh(long)
        outs.append(short)
    return jnp.stack(outs, axis=1)


def _bilstm_ref(x, params_lr, params_rl):
    mem = _lstm_ref(x, params_lr)
    mem = jnp.flip(mem, axis=1)
    return _lstm_ref(mem, params_rl)


# ------------------------------ param init ----------------------------------

def init_lstm_params(key, H):
    """Deterministic init mimicking torch.nn.Linear(2H, H) default (uniform ±1/sqrt(2H))."""
    params = {}
    bound = 1.0 / float(jnp.sqrt(2.0 * H))
    for name in GATE_ORDER:
        key, kw, kb = jax.random.split(key, 3)
        w = jax.random.uniform(kw, (2 * H, H), jnp.float32, -bound, bound)
        b = jax.random.uniform(kb, (1, H), jnp.float32, -bound, bound)
        params[name] = (w, b)
    return key, params


if __name__ == "__main__":
    N, L, H = 2, 8, 32
    key = jax.random.PRNGKey(0)
    key, params_lr = init_lstm_params(key, H)
    key, params_rl = init_lstm_params(key, H)
    key, kx = jax.random.split(key)
    x = jax.random.normal(kx, (N, L, H), jnp.float32)

    ref = _bilstm_ref(x, params_lr, params_rl)

    # f32 matmul path: exact match to the reference.
    out_f32 = jax.block_until_ready(
        bilstm_forward(x, params_lr, params_rl, t_block=4, mm_dtype=jnp.float32))
    assert out_f32.shape == (N, L, H), out_f32.shape
    assert jnp.allclose(out_f32, ref, atol=1e-5, rtol=1e-5), \
        float(jnp.max(jnp.abs(out_f32 - ref)))

    # bf16 matmul operands (weights + hidden state), f32 accumulation & states:
    # the recommended mode for v5e/v6e/v7x MXUs. Looser tolerance for bf16 rounding.
    out_bf16 = jax.block_until_ready(
        bilstm_forward(x, params_lr, params_rl, t_block=4, mm_dtype=jnp.bfloat16))
    assert out_bf16.shape == (N, L, H), out_bf16.shape
    assert jnp.allclose(out_bf16, ref, atol=5e-2, rtol=5e-2), \
        float(jnp.max(jnp.abs(out_bf16 - ref)))

    print("KERNEL_OK")
</pallas_src>

<mosaic_0001>
module attributes {stable_mosaic.version = 11 : i64} {
  func.func @_lstm_recurrence_kernel(%arg0: i32, %arg1: memref<4x2x128xf32, #tpu.memory_space<vmem>>, %arg2: memref<32x128xf32, #tpu.memory_space<vmem>>, %arg3: memref<4x2x32xf32, #tpu.memory_space<vmem>>, %arg4: memref<2x32xf32, #tpu.memory_space<vmem>>, %arg5: memref<2x32xf32, #tpu.memory_space<vmem>>) attributes {dimension_semantics = [#tpu.dimension_semantics<arbitrary>], iteration_bounds = array<i64: 2>, scalar_prefetch = 0 : i64, scratch_operands = 2 : i64, tpu.core_type = #tpu.core_type<tc>, window_params = [{transform_indices = @transform_0, window_bounds = array<i64: 4, 2, 128>}, {pipeline_mode = #tpu.pipeline_mode<synchronous>, transform_indices = @transform_1, window_bounds = array<i64: 32, 128>}, {transform_indices = @transform_2, window_bounds = array<i64: 4, 2, 32>}]} {
    %c0_i32 = arith.constant 0 : i32
    %0 = arith.cmpi eq, %arg0, %c0_i32 : i32
    %1 = arith.extui %0 : i1 to i32
    %c0_i32_0 = arith.constant 0 : i32
    %2 = arith.cmpi ne, %1, %c0_i32_0 : i32
    scf.if %2 {
      %cst_72 = arith.constant 0.000000e+00 : f32
      %155 = vector.broadcast %cst_72 : f32 to vector<2x32xf32>
      %c0_73 = arith.constant 0 : index
      %c0_74 = arith.constant 0 : index
      %156 = vector.load %arg4[%c0_73, %c0_74] : memref<2x32xf32, #tpu.memory_space<vmem>>, vector<2x32xf32>
      tpu.vector_store %arg4[%c0_73, %c0_74], %155 {strides = array<i32>} : memref<2x32xf32, #tpu.memory_space<vmem>>, vector<2x32xf32>,
      %cst_75 = arith.constant 0.000000e+00 : f32
      %157 = vector.broadcast %cst_75 : f32 to vector<2x32xf32>
      %c0_76 = arith.constant 0 : index
      %c0_77 = arith.constant 0 : index
      %158 = vector.load %arg5[%c0_76, %c0_77] : memref<2x32xf32, #tpu.memory_space<vmem>>, vector<2x32xf32>
      tpu.vector_store %arg5[%c0_76, %c0_77], %157 {strides = array<i32>} : memref<2x32xf32, #tpu.memory_space<vmem>>, vector<2x32xf32>,
    } else {
    }
    %c0_i32_1 = arith.constant 0 : i32
    %3 = arith.index_cast %c0_i32_1 : i32 to index
    %c0 = arith.constant 0 : index
    %c0_2 = arith.constant 0 : index
    %4 = vector.load %arg1[%3, %c0, %c0_2] : memref<4x2x128xf32, #tpu.memory_space<vmem>>, vector<1x2x128xf32>
    %5 = vector.shape_cast %4 : vector<1x2x128xf32> to vector<2x128xf32>
    %c0_3 = arith.constant 0 : index
    %c0_4 = arith.constant 0 : index
    %6 = vector.load %arg5[%c0_3, %c0_4] : memref<2x32xf32, #tpu.memory_space<vmem>>, vector<2x32xf32>
    %c0_5 = arith.constant 0 : index
    %c0_6 = arith.constant 0 : index
    %7 = vector.load %arg2[%c0_5, %c0_6] : memref<32x128xf32, #tpu.memory_space<vmem>>, vector<32x128xf32>
    %cst = arith.constant dense<0.000000e+00> : vector<2x128xf32>
    %8 = tpu.matmul %6, %7, %cst {dimension_numbers = #tpu.dot_dimension_numbers<[1], [0], [0], [1], [0, 0, 1, 1], [], []>} : vector<2x32xf32>, vector<32x128xf32>, vector<2x128xf32> -> vector<2x128xf32>
    %9 = arith.addf %8, %5 : vector<2x128xf32>
    %10 = vector.extract_strided_slice %9 {offsets = [0, 0], sizes = [2, 32], strides = [1, 1]} : vector<2x128xf32> to vector<2x32xf32>
    %11 = arith.negf %10 : vector<2x32xf32>
    %12 = math.exp %11 : vector<2x32xf32>
    %cst_7 = arith.constant 1.000000e+00 : f32
    %13 = vector.broadcast %cst_7 : f32 to vector<2x32xf32>
    %14 = arith.addf %13, %12 : vector<2x32xf32>
    %15 = arith.divf %13, %14 : vector<2x32xf32>
    %16 = vector.extract_strided_slice %9 {offsets = [0, 32], sizes = [2, 32], strides = [1, 1]} : vector<2x128xf32> to vector<2x32xf32>
    %17 = arith.negf %16 : vector<2x32xf32>
    %18 = math.exp %17 : vector<2x32xf32>
    %cst_8 = arith.constant 1.000000e+00 : f32
    %19 = vector.broadcast %cst_8 : f32 to vector<2x32xf32>
    %20 = arith.addf %19, %18 : vector<2x32xf32>
    %21 = arith.divf %19, %20 : vector<2x32xf32>
    %22 = vector.extract_strided_slice %9 {offsets = [0, 64], sizes = [2, 32], strides = [1, 1]} : vector<2x128xf32> to vector<2x32xf32>
    %23 = arith.negf %22 : vector<2x32xf32>
    %24 = math.exp %23 : vector<2x32xf32>
    %cst_9 = arith.constant 1.000000e+00 : f32
    %25 = vector.broadcast %cst_9 : f32 to vector<2x32xf32>
    %26 = arith.addf %25, %24 : vector<2x32xf32>
    %27 = arith.divf %25, %26 : vector<2x32xf32>
    %28 = vector.extract_strided_slice %9 {offsets = [0, 96], sizes = [2, 32], strides = [1, 1]} : vector<2x128xf32> to vector<2x32xf32>
    %c0_10 = arith.constant 0 : index
    %c0_11 = arith.constant 0 : index
    %29 = vector.load %arg4[%c0_10, %c0_11] : memref<2x32xf32, #tpu.memory_space<vmem>>, vector<2x32xf32>
    %30 = arith.mulf %15, %29 : vector<2x32xf32>
    %31 = arith.mulf %21, %28 : vector<2x32xf32>
    %32 = arith.addf %30, %31 : vector<2x32xf32>
    %33 = math.tanh %32 : vector<2x32xf32>
    %34 = arith.mulf %27, %33 : vector<2x32xf32>
    %c0_12 = arith.constant 0 : index
    %c0_13 = arith.constant 0 : index
    %35 = vector.load %arg4[%c0_12, %c0_13] : memref<2x32xf32, #tpu.memory_space<vmem>>, vector<2x32xf32>
    tpu.vector_store %arg4[%c0_12, %c0_13], %32 {strides = array<i32>} : memref<2x32xf32, #tpu.memory_space<vmem>>, vector<2x32xf32>,
    %c0_14 = arith.constant 0 : index
    %c0_15 = arith.constant 0 : index
    %36 = vector.load %arg5[%c0_14, %c0_15] : memref<2x32xf32, #tpu.memory_space<vmem>>, vector<2x32xf32>
    tpu.vector_store %arg5[%c0_14, %c0_15], %34 {strides = array<i32>} : memref<2x32xf32, #tpu.memory_space<vmem>>, vector<2x32xf32>,
    %37 = arith.index_cast %c0_i32_1 : i32 to index
    %c0_16 = arith.constant 0 : index
    %c0_17 = arith.constant 0 : index
    %38 = vector.load %arg3[%37, %c0_16, %c0_17] : memref<4x2x32xf32, #tpu.memory_space<vmem>>, vector<1x2x32xf32>
    %39 = vector.shape_cast %38 : vector<1x2x32xf32> to vector<2x32xf32>
    %40 = vector.shape_cast %34 : vector<2x32xf32> to vector<1x2x32xf32>
    tpu.vector_store %arg3[%37, %c0_16, %c0_17], %40 {strides = array<i32>} : memref<4x2x32xf32, #tpu.memory_space<vmem>>, vector<1x2x32xf32>,
    %c1_i32 = arith.constant 1 : i32
    %41 = arith.index_cast %c1_i32 : i32 to index
    %c0_18 = arith.constant 0 : index
    %c0_19 = arith.constant 0 : index
    %42 = vector.load %arg1[%41, %c0_18, %c0_19] : memref<4x2x128xf32, #tpu.memory_space<vmem>>, vector<1x2x128xf32>
    %43 = vector.shape_cast %42 : vector<1x2x128xf32> to vector<2x128xf32>
    %c0_20 = arith.constant 0 : index
    %c0_21 = arith.constant 0 : index
    %44 = vector.load %arg5[%c0_20, %c0_21] : memref<2x32xf32, #tpu.memory_space<vmem>>, vector<2x32xf32>
    %c0_22 = arith.constant 0 : index
    %c0_23 = arith.constant 0 : index
    %45 = vector.load %arg2[%c0_22, %c0_23] : memref<32x128xf32, #tpu.memory_space<vmem>>, vector<32x128xf32>
    %cst_24 = arith.constant dense<0.000000e+00> : vector<2x128xf32>
    %46 = tpu.matmul %44, %45, %cst_24 {dimension_numbers = #tpu.dot_dimension_numbers<[1], [0], [0], [1], [0, 0, 1, 1], [], []>} : vector<2x32xf32>, vector<32x128xf32>, vector<2x128xf32> -> vector<2x128xf32>
    %47 = arith.addf %46, %43 : vector<2x128xf32>
    %48 = vector.extract_strided_slice %47 {offsets = [0, 0], sizes = [2, 32], strides = [1, 1]} : vector<2x128xf32> to vector<2x32xf32>
    %49 = arith.negf %48 : vector<2x32xf32>
    %50 = math.exp %49 : vector<2x32xf32>
    %cst_25 = arith.constant 1.000000e+00 : f32
    %51 = vector.broadcast %cst_25 : f32 to vector<2x32xf32>
    %52 = arith.addf %51, %50 : vector<2x32xf32>
    %53 = arith.divf %51, %52 : vector<2x32xf32>
    %54 = vector.extract_strided_slice %47 {offsets = [0, 32], sizes = [2, 32], strides = [1, 1]} : vector<2x128xf32> to vector<2x32xf32>
    %55 = arith.negf %54 : vector<2x32xf32>
    %56 = math.exp %55 : vector<2x32xf32>
    %cst_26 = arith.constant 1.000000e+00 : f32
    %57 = vector.broadcast %cst_26 : f32 to vector<2x32xf32>
    %58 = arith.addf %57, %56 : vector<2x32xf32>
    %59 = arith.divf %57, %58 : vector<2x32xf32>
    %60 = vector.extract_strided_slice %47 {offsets = [0, 64], sizes = [2, 32], strides = [1, 1]} : vector<2x128xf32> to vector<2x32xf32>
    %61 = arith.negf %60 : vector<2x32xf32>
    %62 = math.exp %61 : vector<2x32xf32>
    %cst_27 = arith.constant 1.000000e+00 : f32
    %63 = vector.broadcast %cst_27 : f32 to vector<2x32xf32>
    %64 = arith.addf %63, %62 : vector<2x32xf32>
    %65 = arith.divf %63, %64 : vector<2x32xf32>
    %66 = vector.extract_strided_slice %47 {offsets = [0, 96], sizes = [2, 32], strides = [1, 1]} : vector<2x128xf32> to vector<2x32xf32>
    %c0_28 = arith.constant 0 : index
    %c0_29 = arith.constant 0 : index
    %67 = vector.load %arg4[%c0_28, %c0_29] : memref<2x32xf32, #tpu.memory_space<vmem>>, vector<2x32xf32>
    %68 = arith.mulf %53, %67 : vector<2x32xf32>
    %69 = arith.mulf %59, %66 : vector<2x32xf32>
    %70 = arith.addf %68, %69 : vector<2x32xf32>
    %71 = math.tanh %70 : vector<2x32xf32>
    %72 = arith.mulf %65, %71 : vector<2x32xf32>
    %c0_30 = arith.constant 0 : index
    %c0_31 = arith.constant 0 : index
    %73 = vector.load %arg4[%c0_30, %c0_31] : memref<2x32xf32, #tpu.memory_space<vmem>>, vector<2x32xf32>
    tpu.vector_store %arg4[%c0_30, %c0_31], %70 {strides = array<i32>} : memref<2x32xf32, #tpu.memory_space<vmem>>, vector<2x32xf32>,
    %c0_32 = arith.constant 0 : index
    %c0_33 = arith.constant 0 : index
    %74 = vector.load %arg5[%c0_32, %c0_33] : memref<2x32xf32, #tpu.memory_space<vmem>>, vector<2x32xf32>
    tpu.vector_store %arg5[%c0_32, %c0_33], %72 {strides = array<i32>} : memref<2x32xf32, #tpu.memory_space<vmem>>, vector<2x32xf32>,
    %75 = arith.index_cast %c1_i32 : i32 to index
    %c0_34 = arith.constant 0 : index
    %c0_35 = arith.constant 0 : index
    %76 = vector.load %arg3[%75, %c0_34, %c0_35] : memref<4x2x32xf32, #tpu.memory_space<vmem>>, vector<1x2x32xf32>
    %77 = vector.shape_cast %76 : vector<1x2x32xf32> to vector<2x32xf32>
    %78 = vector.shape_cast %72 : vector<2x32xf32> to vector<1x2x32xf32>
    tpu.vector_store %arg3[%75, %c0_34, %c0_35], %78 {strides = array<i32>} : memref<4x2x32xf32, #tpu.memory_space<vmem>>, vector<1x2x32xf32>,
    %c2_i32 = arith.constant 2 : i32
    %79 = arith.index_cast %c2_i32 : i32 to index
    %c0_36 = arith.constant 0 : index
    %c0_37 = arith.constant 0 : index
    %80 = vector.load %arg1[%79, %c0_36, %c0_37] : memref<4x2x128xf32, #tpu.memory_space<vmem>>, vector<1x2x128xf32>
    %81 = vector.shape_cast %80 : vector<1x2x128xf32> to vector<2x128xf32>
    %c0_38 = arith.constant 0 : index
    %c0_39 = arith.constant 0 : index
    %82 = vector.load %arg5[%c0_38, %c0_39] : memref<2x32xf32, #tpu.memory_space<vmem>>, vector<2x32xf32>
    %c0_40 = arith.constant 0 : index
    %c0_41 = arith.constant 0 : index
    %83 = vector.load %arg2[%c0_40, %c0_41] : memref<32x128xf32, #tpu.memory_space<vmem>>, vector<32x128xf32>
    %cst_42 = arith.constant dense<0.000000e+00> : vector<2x128xf32>
    %84 = tpu.matmul %82, %83, %cst_42 {dimension_numbers = #tpu.dot_dimension_numbers<[1], [0], [0], [1], [0, 0, 1, 1], [], []>} : vector<2x32xf32>, vector<32x128xf32>, vector<2x128xf32> -> vector<2x128xf32>
    %85 = arith.addf %84, %81 : vector<2x128xf32>
    %86 = vector.extract_strided_slice %85 {offsets = [0, 0], sizes = [2, 32], strides = [1, 1]} : vector<2x128xf32> to vector<2x32xf32>
    %87 = arith.negf %86 : vector<2x32xf32>
    %88 = math.exp %87 : vector<2x32xf32>
    %cst_43 = arith.constant 1.000000e+00 : f32
    %89 = vector.broadcast %cst_43 : f32 to vector<2x32xf32>
    %90 = arith.addf %89, %88 : vector<2x32xf32>
    %91 = arith.divf %89, %90 : vector<2x32xf32>
    %92 = vector.extract_strided_slice %85 {offsets = [0, 32], sizes = [2, 32], strides = [1, 1]} : vector<2x128xf32> to vector<2x32xf32>
    %93 = arith.negf %92 : vector<2x32xf32>
    %94 = math.exp %93 : vector<2x32xf32>
    %cst_44 = arith.constant 1.000000e+00 : f32
    %95 = vector.broadcast %cst_44 : f32 to vector<2x32xf32>
    %96 = arith.addf %95, %94 : vector<2x32xf32>
    %97 = arith.divf %95, %96 : vector<2x32xf32>
    %98 = vector.extract_strided_slice %85 {offsets = [0, 64], sizes = [2, 32], strides = [1, 1]} : vector<2x128xf32> to vector<2x32xf32>
    %99 = arith.negf %98 : vector<2x32xf32>
    %100 = math.exp %99 : vector<2x32xf32>
    %cst_45 = arith.constant 1.000000e+00 : f32
    %101 = vector.broadcast %cst_45 : f32 to vector<2x32xf32>
    %102 = arith.addf %101, %100 : vector<2x32xf32>
    %103 = arith.divf %101, %102 : vector<2x32xf32>
    %104 = vector.extract_strided_slice %85 {offsets = [0, 96], sizes = [2, 32], strides = [1, 1]} : vector<2x128xf32> to vector<2x32xf32>
    %c0_46 = arith.constant 0 : index
    %c0_47 = arith.constant 0 : index
    %105 = vector.load %arg4[%c0_46, %c0_47] : memref<2x32xf32, #tpu.memory_space<vmem>>, vector<2x32xf32>
    %106 = arith.mulf %91, %105 : vector<2x32xf32>
    %107 = arith.mulf %97, %104 : vector<2x32xf32>
    %108 = arith.addf %106, %107 : vector<2x32xf32>
    %109 = math.tanh %108 : vector<2x32xf32>
    %110 = arith.mulf %103, %109 : vector<2x32xf32>
    %c0_48 = arith.constant 0 : index
    %c0_49 = arith.constant 0 : index
    %111 = vector.load %arg4[%c0_48, %c0_49] : memref<2x32xf32, #tpu.memory_space<vmem>>, vector<2x32xf32>
    tpu.vector_store %arg4[%c0_48, %c0_49], %108 {strides = array<i32>} : memref<2x32xf32, #tpu.memory_space<vmem>>, vector<2x32xf32>,
    %c0_50 = arith.constant 0 : index
    %c0_51 = arith.constant 0 : index
    %112 = vector.load %arg5[%c0_50, %c0_51] : memref<2x32xf32, #tpu.memory_space<vmem>>, vector<2x32xf32>
    tpu.vector_store %arg5[%c0_50, %c0_51], %110 {strides = array<i32>} : memref<2x32xf32, #tpu.memory_space<vmem>>, vector<2x32xf32>,
    %113 = arith.index_cast %c2_i32 : i32 to index
    %c0_52 = arith.constant 0 : index
    %c0_53 = arith.constant 0 : index
    %114 = vector.load %arg3[%113, %c0_52, %c0_53] : memref<4x2x32xf32, #tpu.memory_space<vmem>>, vector<1x2x32xf32>
    %115 = vector.shape_cast %114 : vector<1x2x32xf32> to vector<2x32xf32>
    %116 = vector.shape_cast %110 : vector<2x32xf32> to vector<1x2x32xf32>
    tpu.vector_store %arg3[%113, %c0_52, %c0_53], %116 {strides = array<i32>} : memref<4x2x32xf32, #tpu.memory_space<vmem>>, vector<1x2x32xf32>,
    %c3_i32 = arith.constant 3 : i32
    %117 = arith.index_cast %c3_i32 : i32 to index
    %c0_54 = arith.constant 0 : index
    %c0_55 = arith.constant 0 : index
    %118 = vector.load %arg1[%117, %c0_54, %c0_55] : memref<4x2x128xf32, #tpu.memory_space<vmem>>, vector<1x2x128xf32>
    %119 = vector.shape_cast %118 : vector<1x2x128xf32> to vector<2x128xf32>
    %c0_56 = arith.constant 0 : index
    %c0_57 = arith.constant 0 : index
    %120 = vector.load %arg5[%c0_56, %c0_57] : memref<2x32xf32, #tpu.memory_space<vmem>>, vector<2x32xf32>
    %c0_58 = arith.constant 0 : index
    %c0_59 = arith.constant 0 : index
    %121 = vector.load %arg2[%c0_58, %c0_59] : memref<32x128xf32, #tpu.memory_space<vmem>>, vector<32x128xf32>
    %cst_60 = arith.constant dense<0.000000e+00> : vector<2x128xf32>
    %122 = tpu.matmul %120, %121, %cst_60 {dimension_numbers = #tpu.dot_dimension_numbers<[1], [0], [0], [1], [0, 0, 1, 1], [], []>} : vector<2x32xf32>, vector<32x128xf32>, vector<2x128xf32> -> vector<2x128xf32>
    %123 = arith.addf %122, %119 : vector<2x128xf32>
    %124 = vector.extract_strided_slice %123 {offsets = [0, 0], sizes = [2, 32], strides = [1, 1]} : vector<2x128xf32> to vector<2x32xf32>
    %125 = arith.negf %124 : vector<2x32xf32>
    %126 = math.exp %125 : vector<2x32xf32>
    %cst_61 = arith.constant 1.000000e+00 : f32
    %127 = vector.broadcast %cst_61 : f32 to vector<2x32xf32>
    %128 = arith.addf %127, %126 : vector<2x32xf32>
    %129 = arith.divf %127, %128 : vector<2x32xf32>
    %130 = vector.extract_strided_slice %123 {offsets = [0, 32], sizes = [2, 32], strides = [1, 1]} : vector<2x128xf32> to vector<2x32xf32>
    %131 = arith.negf %130 : vector<2x32xf32>
    %132 = math.exp %131 : vector<2x32xf32>
    %cst_62 = arith.constant 1.000000e+00 : f32
    %133 = vector.broadcast %cst_62 : f32 to vector<2x32xf32>
    %134 = arith.addf %133, %132 : vector<2x32xf32>
    %135 = arith.divf %133, %134 : vector<2x32xf32>
    %136 = vector.extract_strided_slice %123 {offsets = [0, 64], sizes = [2, 32], strides = [1, 1]} : vector<2x128xf32> to vector<2x32xf32>
    %137 = arith.negf %136 : vector<2x32xf32>
    %138 = math.exp %137 : vector<2x32xf32>
    %cst_63 = arith.constant 1.000000e+00 : f32
    %139 = vector.broadcast %cst_63 : f32 to vector<2x32xf32>
    %140 = arith.addf %139, %138 : vector<2x32xf32>
    %141 = arith.divf %139, %140 : vector<2x32xf32>
    %142 = vector.extract_strided_slice %123 {offsets = [0, 96], sizes = [2, 32], strides = [1, 1]} : vector<2x128xf32> to vector<2x32xf32>
    %c0_64 = arith.constant 0 : index
    %c0_65 = arith.constant 0 : index
    %143 = vector.load %arg4[%c0_64, %c0_65] : memref<2x32xf32, #tpu.memory_space<vmem>>, vector<2x32xf32>
    %144 = arith.mulf %129, %143 : vector<2x32xf32>
    %145 = arith.mulf %135, %142 : vector<2x32xf32>
    %146 = arith.addf %144, %145 : vector<2x32xf32>
    %147 = math.tanh %146 : vector<2x32xf32>
    %148 = arith.mulf %141, %147 : vector<2x32xf32>
    %c0_66 = arith.constant 0 : index
    %c0_67 = arith.constant 0 : index
    %149 = vector.load %arg4[%c0_66, %c0_67] : memref<2x32xf32, #tpu.memory_space<vmem>>, vector<2x32xf32>
    tpu.vector_store %arg4[%c0_66, %c0_67], %146 {strides = array<i32>} : memref<2x32xf32, #tpu.memory_space<vmem>>, vector<2x32xf32>,
    %c0_68 = arith.constant 0 : index
    %c0_69 = arith.constant 0 : index
    %150 = vector.load %arg5[%c0_68, %c0_69] : memref<2x32xf32, #tpu.memory_space<vmem>>, vector<2x32xf32>
    tpu.vector_store %arg5[%c0_68, %c0_69], %148 {strides = array<i32>} : memref<2x32xf32, #tpu.memory_space<vmem>>, vector<2x32xf32>,
    %151 = arith.index_cast %c3_i32 : i32 to index
    %c0_70 = arith.constant 0 : index
    %c0_71 = arith.constant 0 : index
    %152 = vector.load %arg3[%151, %c0_70, %c0_71] : memref<4x2x32xf32, #tpu.memory_space<vmem>>, vector<1x2x32xf32>
    %153 = vector.shape_cast %152 : vector<1x2x32xf32> to vector<2x32xf32>
    %154 = vector.shape_cast %148 : vector<2x32xf32> to vector<1x2x32xf32>
    tpu.vector_store %arg3[%151, %c0_70, %c0_71], %154 {strides = array<i32>} : memref<4x2x32xf32, #tpu.memory_space<vmem>>, vector<1x2x32xf32>,
    %c4_i32 = arith.constant 4 : i32
    return
  }
  func.func @transform_0(%arg0: i32) -> (i32, i32, i32) {
    %c0_i32 = arith.constant 0 : i32
    %c0_i32_0 = arith.constant 0 : i32
    %c0_i32_1 = arith.constant 0 : i32
    return %arg0, %c0_i32, %c0_i32_0 : i32, i32, i32
  }
  func.func @transform_1(%arg0: i32) -> (i32, i32) {
    %c0_i32 = arith.constant 0 : i32
    %c0_i32_0 = arith.constant 0 : i32
    %c0_i32_1 = arith.constant 0 : i32
    return %c0_i32, %c0_i32_0 : i32, i32
  }
  func.func @transform_2(%arg0: i32) -> (i32, i32, i32) {
    %c0_i32 = arith.constant 0 : i32
    %c0_i32_0 = arith.constant 0 : i32
    %c0_i32_1 = arith.constant 0 : i32
    return %arg0, %c0_i32, %c0_i32_0 : i32, i32, i32
  }
}

</mosaic_0001>

<bundles_post_ra>
// kernel: tpu_custom_call.1
= control target key start
LH: loop header
LB: loop body
LE: loop exit
PB: predicated region body
PF: predicated region fallthrough
CT: control target
= control target key end

     0   :  { %7 = vsyncpa [#allocation5], 0  ;;  %s1340_s0 = inlined_call_operand.hbm [shape: f32[8,2,128], index: 0, kind: input, shape index: {}]   ;;  %s1341_s1 = inlined_call_operand.hbm [shape: f32[32,128], index: 1, kind: input, shape index: {}]   ;;  %s1342_s2 = inlined_call_operand.hbm [shape: f32[8,2,32], index: 2, kind: output, shape index: {}]  }
   0x1   :  { %9 = vsyncpa [#allocation5 + $0x1], 0 }
   0x2   :  { %10 = vsyncpa [#allocation8], 0 }
   0x3   :  { %11 = vsyncpa [#allocation6], 0 }
   0x4   :  { %13 = vsyncpa [#allocation6 + $0x1], 0  ;;  %s1073_s9 = smov 0   ;;  %s1075_s10 = smov 0  }
   0x5   :  { %s1077_s11 = smov 0   ;;  %s1079_s12 = smov 0  }
   0x6 LB: > { %s1094_s13 = sadd.s32 4294967295, %s1042_s12   ;;  %s731_s14 = sadd.s32 4294967294, %s1042_s12   ;;  %s1042_s12 = sphi %s1079_s12, %s1365_s12   ;;  %s1038_s11 = sphi %s1077_s11, %s1364_s11   ;;  %s1034_s10 = sphi %s1075_s10, %s1363_s10   ;;  %s1030_s9 = sphi %s1073_s9, %s1362_s9  }
   0x7   : > { %p39_p0 = scmp.ne.s32.totalorder %s1034_s10, %s1030_s9  ;;  %p1343_p1 = scmp.eq.s32.totalorder %s1094_s13, 0 }
   0x8   : > { %p90_p3 = scmp.eq.s32.totalorder %s731_s14, 1  ;;  %p732_p5 = scmp.ge.s32.totalorder %s1042_s12, 1 }
   0x9   : > { %p1103_p4 = por %p1343_p1, %p39_p0  ;;  %p97_p7 = scmp.lt.s32.totalorder %s1042_s12, 3 }
   0xa   : > { %p1108_p6 = por %p90_p3, %p39_p0  ;;  %s1044_s18 = smov [#allocation7]  }
   0xb   : > { %s1347_s15 = scalar_select %p1103_p4, 1, 0 }
   0xc   : > { %s1348_s16 = scalar_select %p1108_p6, 1, 0 }
   0xd   : > { %p1114_p9 = pnand %p732_p5, %p97_p7  ;;  %s109_s19 = sshll.u32 %s1044_s18, 4  ;;  %s110_s19 = int_to_ptr.vmem [resolvable:$true] %s109_s19 }
   0xe   : > { %s1128_s21 = sadd.s32 1, %s1042_s12   ;;  %s26_s22 = sadd.s32 1, %s1038_s11 }
   0xf   : > { %s1349_s17 = scalar_select %p1114_p9, 1, 0 }
  0x10   : > { %p836_p10 = pneg %p1114_p9  ;;  %s23_s23 = ssub.s32 %s1042_s12, %s1128_s21 }
  0x11   : > { %s931_s24 = scalar_lea.vmem %s110_s19, 512  ;;  %p939_p7 = scmp.lt.s32.totalorder %s110_s19, %s110_s19 }
  0x12   : > { %p1123_p12 = pnand %p836_p10, %p1343_p1  ;;  %p932_p0 = scmp.ne.s32.totalorder %s110_s19, %s931_s24 }
  0x13   : > { %p940_p8 = scmp.lt.s32.totalorder %s931_s24, %s931_s24 }
  0x14   : > { %p922_p13 = pneg %p1123_p12 }
  0x15   : > { %p941_p11 = por %p940_p8, %p939_p7 }
  0x16   : > { %p934_p3 = pnand %p932_p0, %p922_p13 }
  0x18   : > { %p935_p5 = pneg %p934_p3 }
  0x1a   : > { %p942_p2 = pnand %p941_p11, %p935_p5 }
  0x1c   : > { %945 = shalt.err (!%p942_p2)
}
  0x1d   : > { %s1045_s25 = smov 128   ;;  %s1046_s26 = smov 8  }
  0x1e   : > { %839 = dma.hbm_to_vmem [thread:$0]  (!%p1123_p12), %s1341_s1, 512, %s110_s19, [#allocation8], %s1045_s25, %s1045_s25, %s1046_s26  }
  0x1f   : > { %p24_p10 = scmp.eq.s32.totalorder %s23_s23, 0  ;;  %p33_p8 = scmp.ne.s32.totalorder %s1038_s11, %s1034_s10 }
  0x20   : > { %p34_p11 = scmp.eq.s32.totalorder %s1042_s12, 0  ;;  %p849_p2 = scmp.lt.s32.totalorder %s1042_s12, 2 }
  0x21   : > { %s1145_s29 = scalar_select %p24_p10, %s1038_s11, %s26_s22  }
  0x22   : > { %p35_p13 = por %p34_p11, %p33_p8  ;;  %p1351_p0 = scmp.eq.s32.totalorder %s1094_s13, 1 }
  0x23   : > { %s123_s3 = sand.u32 1, %s1038_s11   ;;  %s762_s4 = sshll.u32 %s1042_s12, 7 }
  0x24   : > { %p1149_p3 = por %p1351_p0, %p33_p8  ;;  %s735_s5 = sshll.u32 %s123_s3, 3 }
  0x25   : > { %s1158_s8 = scalar_lea.hbm %s1340_s0, %s762_s4  ;;  %s127_s14 = scalar_lea.vmem [#allocation4], %s735_s5 }
  0x26   : > { %s1352_s30 = scalar_select %p1149_p3, 1, 0 }
  0x27   : > { %s134_s18 = sshll.u32 %s127_s14, 4  ;;  %p1160_p12 = pnand %p849_p2, %p35_p13  ;;  %s1164_s18 = int_to_ptr.vmem [resolvable:$true] %s134_s18 }
  0x28   : > { %s1166_s20 = scalar_lea.sflag [#allocation5], %s123_s3  ;;  %s946_s22 = scalar_lea.hbm %s1158_s8, 128 }
  0x29   : > { %p947_p5 = scmp.ne.s32.totalorder %s1158_s8, %s946_s22  ;;  %p948_p7 = pneg %p1160_p12 }
  0x2a   : > { %s951_s25 = scalar_lea.hbm %s1340_s0, 256  ;;  %p952_p11 = scmp.lt.s32.totalorder %s1158_s8, %s1340_s0 }
  0x2b   : > { %p949_p10 = pnand %p948_p7, %p947_p5  ;;  %p953_p2 = scmp.lt.s32.totalorder %s951_s25, %s946_s22 }
  0x2d   : > { %p950_p8 = pneg %p949_p10  ;;  %p954_p13 = por %p953_p2, %p952_p11 }
  0x2f   : > { %p955_p0 = pnand %p954_p13, %p950_p8 }
  0x31   : > { %958 = shalt.err (!%p955_p0)
}
  0x32   : > { %s959_s28 = scalar_lea.vmem %s1164_s18, 128  ;;  %s1047_s3 = smov [#allocation4]  }
  0x33   : > { %p960_p1 = scmp.ne.s32.totalorder %s1164_s18, %s959_s28  ;;  %s964_s4 = sshll.u32 %s1047_s3, 4  ;;  %s965_s4 = int_to_ptr.vmem [resolvable:$false] %s964_s4 }
  0x34   : > { %s966_s5 = scalar_lea.vmem %s965_s4, 256  ;;  %p967_p10 = scmp.lt.s32.totalorder %s1164_s18, %s965_s4 }
  0x35   : > { %p962_p6 = pnand %p960_p1, %p948_p7  ;;  %p968_p3 = scmp.lt.s32.totalorder %s966_s5, %s959_s28 }
  0x37   : > { %p963_p5 = pneg %p962_p6  ;;  %p969_p4 = por %p968_p3, %p967_p10 }
  0x39   : > { %p970_p9 = pnand %p969_p4, %p963_p5 }
  0x3b   : > { %973 = shalt.err (!%p970_p9)
}
  0x3c   : > { %s1048_s6 = smov 32   ;;  %s1049_s7 = smov 2  }
  0x3d   : > { %843 = dma.hbm_to_vmem [thread:$0]  (!%p1160_p12), %s1158_s8, 128, %s1164_s18, %s1166_s20, %s1048_s6, %s1048_s6, %s1049_s7  }
  0x3e   : > { %p1354_p1 = scmp.ne.s32.totalorder %s1349_s17, 0 }
  0x3f   : > { %s1190_s14 = sand.u32 (!%p1354_p1), 1, %s1034_s10   ;;  %p1355_p4 = scmp.ne.s32.totalorder (!%p1354_p1), %s1347_s15, 0 }
  0x40   : > { %146 = sbr.rel (%p1354_p1) target bundleno = 2829 (0xb0d), region = 28  ;;  %s739_s22 = sshll.u32 (!%p1354_p1), %s1190_s14, 3 }
  0x41   : > { %s149_s23 = scalar_lea.sflag (!%p1354_p1), [#allocation5], %s1190_s14  ;;  %s1194_s24 = scalar_lea.vmem (!%p1354_p1), [#allocation4], %s739_s22 }
  0x45   : > { %1017 = dma.done.wait (%p1355_p4), %s149_s23, 128  }
  0x46   : > { %1019 = vsyncadd (%p1355_p4), %s149_s23, 4294967168  ;;  %p1356_p6 = scmp.eq.s32.totalorder %s1094_s13, 0 }
  0x48   : > { %1021 = dma.done.wait (%p1356_p6), [#allocation8], 512   ;;  %p1357_p9 = pmov %p1356_p6 }
  0x49   : > { %s1204_s17 = scalar_lea.vmem [#allocation9], %s739_s22  ;;  %p1358_p3 = scmp.ne.s32.totalorder %s1094_s13, 0 }
  0x4a   : > { %1023 = vsyncadd (%p1357_p9), [#allocation8], 4294966784 }
  0x4b   : > { %182 = sbr.rel (%p1358_p3) target bundleno = 82 (0x52), region = 40 }
  0x50   : > { %vm183_vm0 = vcmask 254976   ;;  %v1050_v0 = vmov 0.0  }
  0x51   : > { %184 = vst.msk [vmem:[#allocation2] sm:$0x3] %vm183_vm0, %v1050_v0  ;;  %185 = vst.msk [vmem:[#allocation3] sm:$0x3] %vm183_vm0, %v1050_v0 }
  0x52 PF: > { %v1208_v1 = vld [vmem:[#allocation7 + $0x18] sm:$0xff]  ;;  %v1051_v2 = vmov 0.0   ;;  %v1211_v3 = vld [vmem:[#allocation7 + $0x10] sm:$0xff]  ;;  %vm1052_vm1 = vmmov 0   ;;  %v1218_v4 = vld [vmem:[#allocation7 + $0x8] sm:$0xff]  ;;  %vm192_vm2 = vcmask 261120  }
  0x53   : > { %784 = vmatprep.subr.mxu0 %v1051_v2  ;;  %792 = vmatprep.mubr.msk.f32.mxu0 %vm1052_vm1, %v1051_v2  ;;  %v188_v5 = vld [vmem:[#allocation7] sm:$0xff]  ;;  %v186_v7 = vld [vmem:[%s1194_s24] sm:$0x3]  ;;  %s1053_s15 = smov 64   ;;  %s1054_s8 = smov 96   ;;  %vm290_vm3 = vcmask 254976  }
  0x54   : > { %785 = vmatpush3.msra.mxu0 %v1208_v1  ;;  %795 = vmatprep.subr.mxu1 %v1051_v2  ;;  %v745_v26 = vld [vmem:[%s1194_s24 + $0x2] sm:$0x3]  ;;  %v749_v45 = vld [vmem:[%s1194_s24 + $0x4] sm:$0x3]  ;;  %v753_v0 = vld [vmem:[%s1194_s24 + $0x6] sm:$0x3] }
  0x55   : > { %786 = vmatprep.subr.mxu0 %v1051_v2  ;;  %796 = vmatpush3.msra.mxu1 %v1208_v1  ;;  %s763_s18 = sshll.u32 %s1094_s13, 7  ;;  %s648_s19 = sshll.u32 %s1204_s17, 4  ;;  %s1294_s19 = int_to_ptr.vmem [resolvable:$true] %s648_s19 }
  0x56   : > { %787 = vmatpush3.msra.mxu0 %v1211_v3  ;;  %797 = vmatprep.subr.mxu1 %v1051_v2  ;;  %s1292_s26 = scalar_lea.hbm %s1342_s2, %s763_s18  ;;  %s635_s27 = scalar_lea.sflag [#allocation6], %s1190_s14 }
  0x57   : > { %788 = vmatprep.subr.mxu0 %v1051_v2  ;;  %798 = vmatpush3.msra.mxu1 %v1211_v3  ;;  %s974_s28 = scalar_lea.vmem %s1294_s19, 128  ;;  %p1359_p7 = scmp.ne.s32.totalorder %s1352_s30, 0 }
  0x58   : > { %789 = vmatpush3.msra.mxu0 %v1218_v4  ;;  %v187_v6 = vld [vmem:[#allocation3] sm:$0x3]  ;;  %799 = vmatprep.subr.mxu1 %v1051_v2  ;;  %v272_v17 = vld [vmem:[#allocation2] sm:$0x3]  ;;  %p975_p12 = scmp.ne.s32.totalorder %s1294_s19, %s974_s28  ;;  %s1055_s13 = smov [#allocation9]  }
  0x59   : > { %790 = vmatprep.subr.mxu0 %v1051_v2  ;;  %800 = vmatpush3.msra.mxu1 %v1218_v4  ;;  %s978_s3 = sshll.u32 %s1055_s13, 4  ;;  %s979_s3 = int_to_ptr.vmem [resolvable:$false] %s978_s3 }
  0x5a   : > { %791 = vmatpush3.msra.mxu0 %v188_v5  ;;  %801 = vmatprep.subr.mxu1 %v1051_v2  ;;  %p976_p8 = pnand %p975_p12, %p1359_p7  ;;  %s980_s4 = scalar_lea.vmem %s979_s3, 256 }
  0x5b   : > { %793 = vmatmul.mubr.msk.f32.vlgmr.msra.gmra.mxu0 %vm192_vm2, %v187_v6  ;;  %802 = vmatpush3.msra.mxu1 %v188_v5  ;;  %p981_p2 = scmp.lt.s32.totalorder %s1294_s19, %s979_s3  ;;  %p982_p13 = scmp.lt.s32.totalorder %s980_s4, %s974_s28 }
  0x5c   : > { %803 = vmatprep.mubr.msk.f32.mxu1 %vm1052_vm1, %v1051_v2  ;;  %806 = vmatprep.subr.mxu0 %v1051_v2  ;;  %p977_p11 = pneg %p976_p8 }
  0x5d   : > { %807 = vmatpush3.msra.mxu0 %v1208_v1  ;;  %814 = vmatprep.mubr.msk.f32.mxu0 %vm1052_vm1, %v1051_v2  ;;  %p983_p0 = por %p982_p13, %p981_p2 }
  0x5e   : > { %808 = vmatprep.subr.mxu0 %v1051_v2  ;;  %817 = vmatprep.subr.mxu1 %v1051_v2 }
  0x5f   : > { %809 = vmatpush3.msra.mxu0 %v1211_v3  ;;  %p984_p5 = pnand %p983_p0, %p977_p11 }
  0x60   : > { %810 = vmatprep.subr.mxu0 %v1051_v2 }
  0x61   : > { %811 = vmatpush3.msra.mxu0 %v1218_v4 }
  0x62   : > { %812 = vmatprep.subr.mxu0 %v1051_v2 }
  0x63   : > { %813 = vmatpush3.msra.mxu0 %v188_v5 }
 0x11b   : > { %v262_v8 = vpop.f32.mrf.mxu0 }
 0x11c   : > { %v263_v9 = vadd.f32 %v262_v8, %v186_v7 }
 0x11d   : > { %v794_v10 = vpop.f32.mrf.mxu0 }
 0x11e   : > { %275 = vrot.lane.b32.xlu0 %v263_v9, %s1053_s15  ;;  %v744_v11 = vmul.f32 -1.442695, %v263_v9 }
 0x120   : > { %896 = vpow2.f32 %v744_v11 }
 0x12d   : > { %v897_v12 = vpop.eup %896 }
 0x12e   : > { %v269_v13 = vadd.f32 1.0, %v897_v12 }
 0x130   : > { %898 = vrcp.f32 %v269_v13 }
 0x13d   : > { %v899_v14 = vpop.eup %898 }
 0x13e   : > { %v273_v18 = vmul.f32 %v899_v14, %v272_v17 }
 0x190   : > { %v276_v15 = vpop.permute.xlu0 %275 }
 0x191   : > { %v278_v16 = vmul.f32 %v899_v14, %v276_v15 }
 0x193   : > { %280 = vrot.lane.b32.xlu0 %v278_v16, %s1054_s8 }
 0x205   : > { %v281_v19 = vpop.permute.xlu0 %280 }
 0x206   : > { %v283_v20 = vadd.f32 %v281_v19, %v273_v18 }
 0x208   : > { %900 = vtanh.f32 %v283_v20  ;;  %291 = vst.msk [vmem:[#allocation2] sm:$0x3] %vm290_vm3, %v283_v20 }
 0x20f   : > { %v384_v36 = vld [vmem:[#allocation2] sm:$0x3] }
 0x215   : > { %v901_v21 = vpop.eup %900 }
 0x216   : > { %286 = vrot.lane.b32.xlu1 %v901_v21, %s1053_s15 }
 0x288   : > { %v287_v22 = vpop.permute.xlu1 %286 }
 0x289   : > { %v289_v23 = vmul.f32 %v899_v14, %v287_v22 }
 0x28b   : > { %293 = vrot.lane.b32.xlu1 %v289_v23, %s1053_s15 }
 0x2fd   : > { %v294_v24 = vpop.permute.xlu1 %293 }
 0x2fe   : > { %296 = vst.msk [vmem:[#allocation3] sm:$0x3] %vm290_vm3, %v294_v24  ;;  %297 = vst.msk [vmem:[%s1204_s17] sm:$0x3] %vm290_vm3, %v294_v24 }
 0x305   : > { %v300_v25 = vld [vmem:[#allocation3] sm:$0x3] }
 0x306   : > { %804 = vmatmul.mubr.msk.f32.vlgmr.msra.gmra.mxu1 %vm192_vm2, %v300_v25 }
 0x307   : > { %818 = vmatpush3.msra.mxu1 %v1208_v1  ;;  %825 = vmatprep.mubr.msk.f32.mxu1 %vm1052_vm1, %v1051_v2 }
 0x308   : > { %819 = vmatprep.subr.mxu1 %v1051_v2 }
 0x309   : > { %820 = vmatpush3.msra.mxu1 %v1211_v3 }
 0x30a   : > { %821 = vmatprep.subr.mxu1 %v1051_v2 }
 0x30b   : > { %822 = vmatpush3.msra.mxu1 %v1218_v4 }
 0x30c   : > { %823 = vmatprep.subr.mxu1 %v1051_v2 }
 0x30d   : > { %824 = vmatpush3.msra.mxu1 %v188_v5 }
 0x3c6   : > { %v374_v27 = vpop.f32.mrf.mxu1 }
 0x3c7   : > { %v375_v28 = vadd.f32 %v745_v26, %v374_v27 }
 0x3c8   : > { %v805_v29 = vpop.f32.mrf.mxu1 }
 0x3c9   : > { %387 = vrot.lane.b32.xlu0 %v375_v28, %s1053_s15  ;;  %v747_v30 = vmul.f32 -1.442695, %v375_v28 }
 0x3cb   : > { %902 = vpow2.f32 %v747_v30 }
 0x3d8   : > { %v903_v31 = vpop.eup %902 }
 0x3d9   : > { %v381_v32 = vadd.f32 1.0, %v903_v31 }
 0x3db   : > { %904 = vrcp.f32 %v381_v32 }
 0x3e8   : > { %v905_v33 = vpop.eup %904 }
 0x3e9   : > { %v385_v37 = vmul.f32 %v905_v33, %v384_v36 }
 0x43b   : > { %v388_v34 = vpop.permute.xlu0 %387 }
 0x43c   : > { %v390_v35 = vmul.f32 %v905_v33, %v388_v34 }
 0x43e   : > { %392 = vrot.lane.b32.xlu1 %v390_v35, %s1054_s8 }
 0x4b0   : > { %v393_v38 = vpop.permute.xlu1 %392 }
 0x4b1   : > { %v395_v39 = vadd.f32 %v393_v38, %v385_v37 }
 0x4b3   : > { %906 = vtanh.f32 %v395_v39  ;;  %402 = vst.msk [vmem:[#allocation2] sm:$0x3] %vm290_vm3, %v395_v39 }
 0x4ba   : > { %v496_v55 = vld [vmem:[#allocation2] sm:$0x3] }
 0x4c0   : > { %v907_v40 = vpop.eup %906 }
 0x4c1   : > { %398 = vrot.lane.b32.xlu0 %v907_v40, %s1053_s15 }
 0x533   : > { %v399_v41 = vpop.permute.xlu0 %398 }
 0x534   : > { %v401_v42 = vmul.f32 %v905_v33, %v399_v41 }
 0x536   : > { %404 = vrot.lane.b32.xlu1 %v401_v42, %s1053_s15 }
 0x5a8   : > { %v405_v43 = vpop.permute.xlu1 %404 }
 0x5a9   : > { %407 = vst.msk [vmem:[#allocation3] sm:$0x3] %vm290_vm3, %v405_v43  ;;  %748 = vst.msk [vmem:[%s1204_s17 + $0x2] sm:$0x3] %vm290_vm3, %v405_v43 }
 0x5b0   : > { %v412_v44 = vld [vmem:[#allocation3] sm:$0x3] }
 0x5b1   : > { %815 = vmatmul.mubr.msk.f32.vlgmr.msra.gmra.mxu0 %vm192_vm2, %v412_v44 }
 0x671   : > { %v486_v46 = vpop.f32.mrf.mxu0 }
 0x672   : > { %v487_v47 = vadd.f32 %v749_v45, %v486_v46 }
 0x673   : > { %v816_v48 = vpop.f32.mrf.mxu0 }
 0x674   : > { %499 = vrot.lane.b32.xlu0 %v487_v47, %s1053_s15  ;;  %v751_v49 = vmul.f32 -1.442695, %v487_v47 }
 0x676   : > { %908 = vpow2.f32 %v751_v49 }
 0x683   : > { %v909_v50 = vpop.eup %908 }
 0x684   : > { %v493_v51 = vadd.f32 1.0, %v909_v50 }
 0x686   : > { %910 = vrcp.f32 %v493_v51 }
 0x693   : > { %v911_v52 = vpop.eup %910 }
 0x694   : > { %v497_v56 = vmul.f32 %v911_v52, %v496_v55 }
 0x6e6   : > { %v500_v53 = vpop.permute.xlu0 %499 }
 0x6e7   : > { %v502_v54 = vmul.f32 %v911_v52, %v500_v53 }
 0x6e9   : > { %504 = vrot.lane.b32.xlu1 %v502_v54, %s1054_s8 }
 0x75b   : > { %v505_v57 = vpop.permute.xlu1 %504 }
 0x75c   : > { %v507_v58 = vadd.f32 %v505_v57, %v497_v56 }
 0x75e   : > { %912 = vtanh.f32 %v507_v58  ;;  %514 = vst.msk [vmem:[#allocation2] sm:$0x3] %vm290_vm3, %v507_v58 }
 0x765   : > { %v608_v10 = vld [vmem:[#allocation2] sm:$0x3] }
 0x76b   : > { %v913_v59 = vpop.eup %912 }
 0x76c   : > { %510 = vrot.lane.b32.xlu0 %v913_v59, %s1053_s15 }
 0x7de   : > { %v511_v60 = vpop.permute.xlu0 %510 }
 0x7df   : > { %v513_v61 = vmul.f32 %v911_v52, %v511_v60 }
 0x7e1   : > { %516 = vrot.lane.b32.xlu1 %v513_v61, %s1053_s15 }
 0x853   : > { %v517_v62 = vpop.permute.xlu1 %516 }
 0x854   : > { %519 = vst.msk [vmem:[#allocation3] sm:$0x3] %vm290_vm3, %v517_v62  ;;  %752 = vst.msk [vmem:[%s1204_s17 + $0x4] sm:$0x3] %vm290_vm3, %v517_v62 }
 0x85b   : > { %v524_v63 = vld [vmem:[#allocation3] sm:$0x3] }
 0x85c   : > { %826 = vmatmul.mubr.msk.f32.vlgmr.msra.gmra.mxu1 %vm192_vm2, %v524_v63 }
 0x91c   : > { %v598_v1 = vpop.f32.mrf.mxu1 }
 0x91d   : > { %v599_v2 = vadd.f32 %v753_v0, %v598_v1 }
 0x91e   : > { %v827_v3 = vpop.f32.mrf.mxu1 }
 0x91f   : > { %611 = vrot.lane.b32.xlu0 %v599_v2, %s1053_s15  ;;  %v755_v4 = vmul.f32 -1.442695, %v599_v2 }
 0x921   : > { %914 = vpow2.f32 %v755_v4 }
 0x92e   : > { %v915_v5 = vpop.eup %914 }
 0x92f   : > { %v605_v6 = vadd.f32 1.0, %v915_v5 }
 0x931   : > { %916 = vrcp.f32 %v605_v6 }
 0x93e   : > { %v917_v7 = vpop.eup %916 }
 0x93f   : > { %v609_v11 = vmul.f32 %v917_v7, %v608_v10 }
 0x991   : > { %v612_v8 = vpop.permute.xlu0 %611 }
 0x992   : > { %v614_v9 = vmul.f32 %v917_v7, %v612_v8 }
 0x994   : > { %616 = vrot.lane.b32.xlu1 %v614_v9, %s1054_s8 }
 0xa06   : > { %v617_v12 = vpop.permute.xlu1 %616 }
 0xa07   : > { %v619_v13 = vadd.f32 %v617_v12, %v609_v11 }
 0xa09   : > { %918 = vtanh.f32 %v619_v13  ;;  %626 = vst.msk [vmem:[#allocation2] sm:$0x3] %vm290_vm3, %v619_v13 }
 0xa16   : > { %v919_v14 = vpop.eup %918 }
 0xa17   : > { %622 = vrot.lane.b32.xlu0 %v919_v14, %s1053_s15 }
 0xa89   : > { %v623_v15 = vpop.permute.xlu0 %622 }
 0xa8a   : > { %v625_v16 = vmul.f32 %v917_v7, %v623_v15 }
 0xa8c   : > { %628 = vrot.lane.b32.xlu1 %v625_v16, %s1053_s15 }
 0xafe   : > { %v629_v17 = vpop.permute.xlu1 %628 }
 0xaff   : > { %631 = vst.msk [vmem:[#allocation3] sm:$0x3] %vm290_vm3, %v629_v17  ;;  %756 = vst.msk [vmem:[%s1204_s17 + $0x6] sm:$0x3] %vm290_vm3, %v629_v17 }
 0xb00   : > { %987 = shalt.err (!%p984_p5)
}
 0xb01   : > { %s988_s5 = scalar_lea.hbm %s1292_s26, 128  ;;  %s992_s22 = scalar_lea.hbm %s1342_s2, 256 }
 0xb02   : > { %p989_p10 = scmp.ne.s32.totalorder %s1292_s26, %s988_s5  ;;  %p993_p6 = scmp.lt.s32.totalorder %s1292_s26, %s1342_s2 }
 0xb03   : > { %p994_p9 = scmp.lt.s32.totalorder %s992_s22, %s988_s5 }
 0xb04   : > { %p990_p1 = pnand %p989_p10, %p1359_p7 }
 0xb05   : > { %p995_p3 = por %p994_p9, %p993_p6 }
 0xb06   : > { %p991_p4 = pneg %p990_p1 }
 0xb08   : > { %p996_p12 = pnand %p995_p3, %p991_p4 }
 0xb0a   : > { %999 = shalt.err (!%p996_p12)
}
 0xb0b   : > { %s1056_s17 = smov 32   ;;  %s1057_s15 = smov 2  }
 0xb0c   : > { %834 = dma.vmem_to_hbm [thread:$0]  (%p1359_p7), %s1294_s19, 128, %s1292_s26, %s635_s27, %s1056_s17, %s1056_s17, %s1057_s15  }
 0xb0d PF: > { %s663_s8 = sand.u32 1, %s1030_s9   ;;  %p1360_p8 = scmp.ne.s32.totalorder %s1348_s16, 0 }
 0xb0e   : > { %p1361_p11 = scmp.ge.s32.totalorder %s1042_s12, 2  ;;  %s664_s18 = scalar_lea.sflag [#allocation6], %s663_s8 }
 0xb10   : > { %p845_p2 = pnand %p1361_p11, %p1360_p8 }
 0xb12   : > { %p846_p13 = pneg %p845_p2 }
 0xb14   : > { %1025 = dma.done.wait (%p846_p13), %s664_s18, 128  }
 0xb15   : > { %1027 = vsyncadd (%p846_p13), %s664_s18, 4294967168  ;;  %p16_p0 = scmp.ge.s32.totalorder %s1128_s21, 4   ;;  %s1362_s9 = smov %s1034_s10 }
 0xb16   : > { %s1363_s10 = smov %s1038_s11  ;;  %s1364_s11 = smov %s1145_s29 }
 0xb17   : > { %s1365_s12 = smov %s1128_s21  ;;  %18 = sbr.rel (!%p16_p0) target bundleno = 6 (0x6), region = 87 }
 0xb1c   :  { %669 = vsyncpa [#allocation5], 1 }
 0xb1d   :  { %671 = vsyncpa [#allocation5 + $0x1], 1 }
 0xb1e   :  { %672 = vsyncpa [#allocation8], 1 }
 0xb1f   :  { %673 = vsyncpa [#allocation6], 1 }
 0xb20   :  { %675 = vsyncpa [#allocation6 + $0x1], 1 }

</bundles_post_ra>
